<compile_context>
chip_gen: v6e
topology: v6e:2x2x1
jax: 0.10.0
libtpu: 0.0.40
codegen_flags: <defaults>
</compile_context>

<pallas_src>
import functools

import jax
import jax.numpy as jnp
from jax import lax
from jax.experimental import pallas as pl
from jax.experimental.pallas import tpu as pltpu


def _attn_kernel(qkv_ref, wt_ref, b_ref, o_ref, *, inv_scale_factor, seq_len):
    S = seq_len
    wt = wt_ref[...]        # (H, H) already (in_features, out_features)
    b = b_ref[...]          # (1, H)

    # --- fused projection: one (3S, H) @ (H, H) matmul, single bias add ------
    proj = lax.dot_general(
        qkv_ref[...], wt,
        dimension_numbers=(((1,), (0,)), ((), ())),   # plain x @ W_t, no relayout
        preferred_element_type=jnp.float32,
    ) + b

    qp = proj[0 * S:1 * S, :]      # sublane-aligned slices (S == 8)
    kp = proj[1 * S:2 * S, :]
    vp = proj[2 * S:3 * S, :]

    # --- scores: qp @ kp^T with K^T folded into the contraction dims; --------
    # --- q-scaling folded onto the (S, S) tile: (c*q)@k^T == c*(q@k^T) -------
    s = lax.dot_general(
        qp, kp,
        dimension_numbers=(((1,), (1,)), ((), ())),
        preferred_element_type=jnp.float32,
    ) * inv_scale_factor

    # --- numerically-stable softmax over the last axis (exact division) ------
    m = jnp.max(s, axis=-1, keepdims=True)
    e = jnp.exp(s - m)
    p = e / jnp.sum(e, axis=-1, keepdims=True)

    # TODO(synk): nn.Dropout(0.1) is identity in eval mode; stochastic dropout
    # (pltpu.prng_random_bits) intentionally not applied for determinism.

    o_ref[...] = jnp.dot(p, vp, preferred_element_type=jnp.float32).astype(o_ref.dtype)


def attention_model(q, k, v, weight_t, bias, inv_scale_factor):
    """q, k, v: (S, H) f32; weight_t: (H, H) pre-transposed (in, out); bias: (H,)."""
    S, H = q.shape
    # Pre-stack q/k/v into a single operand: one input DMA instead of three,
    # and no in-kernel concat.
    qkv = jnp.concatenate([q, k, v], axis=0)        # (3S, H)
    b2 = bias.reshape(1, H)

    kernel = functools.partial(
        _attn_kernel, inv_scale_factor=float(inv_scale_factor), seq_len=S)
    vmem = pl.BlockSpec(memory_space=pltpu.MemorySpace.VMEM)

    # Everything fits trivially in VMEM at these shapes; a single grid-less
    # invocation is the right structure (launch/DMA-latency bound, not compute
    # bound). If a batch axis ever exists, grid over it inside ONE pallas_call
    # with dimension_semantics=("parallel",) and a lane-dense output.
    return pl.pallas_call(
        kernel,
        out_shape=jax.ShapeDtypeStruct((S, H), jnp.float32),
        in_specs=[vmem, vmem, vmem],
        out_specs=vmem,
    )(qkv, weight_t, b2)


def _reference(q, k, v, weight, bias, inv_scale_factor):
    # weight here is PyTorch-layout (out_features, in_features).
    qp = q @ weight.T + bias
    kp = k @ weight.T + bias
    vp = v @ weight.T + bias
    qp = qp * inv_scale_factor
    s = qp @ kp.T
    p = jax.nn.softmax(s, axis=-1)
    return p @ vp


if __name__ == "__main__":
    # Small shapes consistent with the module's forward (q/k/v all pass through
    # the same Linear(H, H)): seq=8, hidden=32.
    S, H = 8, 32
    inv_scale_factor = 10.0

    key = jax.random.PRNGKey(0)
    kq, kk, kv, kw, kb = jax.random.split(key, 5)
    q = jax.random.normal(kq, (S, H), dtype=jnp.float32)
    k = jax.random.normal(kk, (S, H), dtype=jnp.float32)
    v = jax.random.normal(kv, (S, H), dtype=jnp.float32)

    # Deterministic init of query_proj (Linear(H, H)), PyTorch-style (out, in).
    bound = 1.0 / jnp.sqrt(jnp.float32(H))
    weight = jax.random.uniform(kw, (H, H), minval=-bound, maxval=bound, dtype=jnp.float32)
    bias = jax.random.uniform(kb, (H,), minval=-bound, maxval=bound, dtype=jnp.float32)

    # Parameter prep (amortized, off the hot path): store W pre-transposed.
    weight_t = jnp.asarray(weight.T)                 # (in, out)

    out = attention_model(q, k, v, weight_t, bias, inv_scale_factor)
    out = jax.block_until_ready(out)

    ref = _reference(q, k, v, weight, bias, inv_scale_factor)
    assert out.shape == (S, H)
    assert jnp.allclose(out, ref, atol=1e-5, rtol=1e-5)

    print("KERNEL_OK")
</pallas_src>

<mosaic_0001>
module attributes {stable_mosaic.version = 11 : i64} {
  func.func @_attn_kernel(%arg0: memref<24x32xf32, #tpu.memory_space<vmem>>, %arg1: memref<32x32xf32, #tpu.memory_space<vmem>>, %arg2: memref<1x32xf32, #tpu.memory_space<vmem>>, %arg3: memref<8x32xf32, #tpu.memory_space<vmem>>) attributes {dimension_semantics = [], scalar_prefetch = 0 : i64, scratch_operands = 0 : i64, tpu.core_type = #tpu.core_type<tc>} {
    %c0 = arith.constant 0 : index
    %c0_0 = arith.constant 0 : index
    %0 = vector.load %arg1[%c0, %c0_0] : memref<32x32xf32, #tpu.memory_space<vmem>>, vector<32x32xf32>
    %c0_1 = arith.constant 0 : index
    %c0_2 = arith.constant 0 : index
    %1 = vector.load %arg2[%c0_1, %c0_2] : memref<1x32xf32, #tpu.memory_space<vmem>>, vector<1x32xf32>
    %c0_3 = arith.constant 0 : index
    %c0_4 = arith.constant 0 : index
    %2 = vector.load %arg0[%c0_3, %c0_4] : memref<24x32xf32, #tpu.memory_space<vmem>>, vector<24x32xf32>
    %cst = arith.constant dense<0.000000e+00> : vector<24x32xf32>
    %3 = tpu.matmul %2, %0, %cst {dimension_numbers = #tpu.dot_dimension_numbers<[1], [0], [0], [1], [0, 0, 1, 1], [], []>} : vector<24x32xf32>, vector<32x32xf32>, vector<24x32xf32> -> vector<24x32xf32>
    %4 = vector.broadcast %1 : vector<1x32xf32> to vector<24x32xf32>
    %5 = arith.addf %3, %4 : vector<24x32xf32>
    %6 = vector.extract_strided_slice %5 {offsets = [0, 0], sizes = [8, 32], strides = [1, 1]} : vector<24x32xf32> to vector<8x32xf32>
    %7 = vector.extract_strided_slice %5 {offsets = [8, 0], sizes = [8, 32], strides = [1, 1]} : vector<24x32xf32> to vector<8x32xf32>
    %8 = vector.extract_strided_slice %5 {offsets = [16, 0], sizes = [8, 32], strides = [1, 1]} : vector<24x32xf32> to vector<8x32xf32>
    %cst_5 = arith.constant dense<0.000000e+00> : vector<8x8xf32>
    %9 = tpu.matmul %6, %7, %cst_5 {dimension_numbers = #tpu.dot_dimension_numbers<[1], [1], [0], [0], [0, 0, 1, 0], [], []>} : vector<8x32xf32>, vector<8x32xf32>, vector<8x8xf32> -> vector<8x8xf32>
    %cst_6 = arith.constant 1.000000e+01 : f32
    %10 = vector.broadcast %cst_6 : f32 to vector<8x8xf32>
    %11 = arith.mulf %9, %10 : vector<8x8xf32>
    %cst_7 = arith.constant dense<0xFF800000> : vector<8xf32>
    %12 = vector.multi_reduction <maximumf>, %11, %cst_7 [1] : vector<8x8xf32> to vector<8xf32>
    %13 = vector.shape_cast %12 : vector<8xf32> to vector<8x1xf32>
    %14 = vector.broadcast %13 : vector<8x1xf32> to vector<8x8xf32>
    %15 = arith.subf %11, %14 : vector<8x8xf32>
    %16 = math.exp %15 : vector<8x8xf32>
    %cst_8 = arith.constant dense<0.000000e+00> : vector<8xf32>
    %17 = vector.multi_reduction <add>, %16, %cst_8 [1] : vector<8x8xf32> to vector<8xf32>
    %18 = vector.shape_cast %17 : vector<8xf32> to vector<8x1xf32>
    %19 = vector.broadcast %18 : vector<8x1xf32> to vector<8x8xf32>
    %20 = arith.divf %16, %19 : vector<8x8xf32>
    %cst_9 = arith.constant dense<0.000000e+00> : vector<8x32xf32>
    %21 = tpu.matmul %20, %8, %cst_9 {dimension_numbers = #tpu.dot_dimension_numbers<[1], [0], [0], [1], [0, 0, 1, 1], [], []>} : vector<8x8xf32>, vector<8x32xf32>, vector<8x32xf32> -> vector<8x32xf32>
    %c0_10 = arith.constant 0 : index
    %c0_11 = arith.constant 0 : index
    %22 = vector.load %arg3[%c0_10, %c0_11] : memref<8x32xf32, #tpu.memory_space<vmem>>, vector<8x32xf32>
    tpu.vector_store %arg3[%c0_10, %c0_11], %21 {strides = array<i32>} : memref<8x32xf32, #tpu.memory_space<vmem>>, vector<8x32xf32>,
    return
  }
}

</mosaic_0001>

<bundles_post_ra>
// kernel: tpu_custom_call.1
= control target key start
LH: loop header
LB: loop body
LE: loop exit
PB: predicated region body
PF: predicated region fallthrough
CT: control target
= control target key end

     0   :  { %8 = vsyncpa [#allocation3], 0  ;;  %s501_s0 = inlined_call_operand.hbm [shape: f32[24,32], index: 0, kind: input, shape index: {}]   ;;  %s502_s1 = inlined_call_operand.hbm [shape: f32[32,32], index: 1, kind: input, shape index: {}]   ;;  %s503_s2 = inlined_call_operand.vmem [shape: f32[1,32], index: 2, kind: input, shape index: {}]   ;;  %s504_s3 = inlined_call_operand.hbm [shape: f32[8,32], index: 3, kind: output, shape index: {}]  }
   0x1   :  { %9 = vsyncpa [#allocation6], 0 }
   0x2   :  { %10 = vsyncpa [#allocation4], 0  ;;  %s448_s12 = smov [#allocation2]  }
   0x3   :  { %s16_s13 = sshll.u32 %s448_s12, 4  ;;  %s17_s13 = int_to_ptr.vmem [resolvable:$true] %s16_s13 }
   0x4   :  { %s390_s14 = scalar_lea.vmem %s17_s13, 384  ;;  %p395_p1 = scmp.lt.s32.totalorder %s17_s13, %s17_s13 }
   0x5   :  { %p391_p0 = scmp.ne.s32.totalorder %s17_s13, %s390_s14  ;;  %p396_p2 = scmp.lt.s32.totalorder %s390_s14, %s390_s14 }
   0x7   :  { %p397_p3 = por %p396_p2, %p395_p1 }
   0x9   :  { %p398_p4 = pnand %p397_p3, %p391_p0 }
   0xb   :  { %401 = shalt.err (!%p398_p4)
}
   0xc   :  { %s449_s15 = smov 128   ;;  %s450_s16 = smov 8  }
   0xd   :  { %22 = dma.hbm_to_vmem [thread:$0]  %s501_s0, 384, %s17_s13, [#allocation3], %s449_s15, %s449_s15, %s450_s16  }
   0xe   :  { %s451_s19 = smov [#allocation5]  }
   0xf   :  { %s28_s20 = sshll.u32 %s451_s19, 4  ;;  %s29_s20 = int_to_ptr.vmem [resolvable:$true] %s28_s20 }
  0x10   :  { %s410_s21 = scalar_lea.vmem %s29_s20, 512  ;;  %p415_p6 = scmp.lt.s32.totalorder %s29_s20, %s29_s20 }
  0x11   :  { %p411_p5 = scmp.ne.s32.totalorder %s29_s20, %s410_s21  ;;  %p416_p7 = scmp.lt.s32.totalorder %s410_s21, %s410_s21 }
  0x13   :  { %p417_p8 = por %p416_p7, %p415_p6 }
  0x15   :  { %p418_p9 = pnand %p417_p8, %p411_p5 }
  0x17   :  { %421 = shalt.err (!%p418_p9)
}
  0x18   :  { %34 = dma.hbm_to_vmem [thread:$0]  %s502_s1, 512, %s29_s20, [#allocation6], %s449_s15, %s449_s15, %s450_s16  }
  0x19   :  { %442 = dma.done.wait [#allocation3], 384  }
  0x1a   :  { %443 = vsyncadd [#allocation3], 4294966912 }
  0x1b   :  { %444 = dma.done.wait [#allocation6], 512  }
  0x1c   :  { %445 = vsyncadd [#allocation6], 4294966784  ;;  %v452_v0 = vmov 0.0   ;;  %vm453_vm0 = vmmov 0   ;;  %v46_v1 = vld [vmem:[#allocation5 + $0x18] sm:$0xff]  ;;  %v45_v2 = vld [vmem:[#allocation5 + $0x10] sm:$0xff] }
  0x1d   :  { %344 = vmatprep.subr.mxu0 %v452_v0  ;;  %352 = vmatprep.mubr.msk.f32.mxu0 %vm453_vm0, %v452_v0  ;;  %v44_v3 = vld [vmem:[#allocation5 + $0x8] sm:$0xff]  ;;  %v43_v4 = vld [vmem:[#allocation5] sm:$0xff]  ;;  %vm57_vm1 = vcmask 261120   ;;  %v49_v6 = vld [vmem:[#allocation2 + $0x8] sm:$0xff]  ;;  %vm224_vm2 = vcmask 64512  }
  0x1e   :  { %361 = vmatprep.subr.mxu1 %v452_v0  ;;  %363 = vmatprep.mubr.msk.f32.mxu1 %vm453_vm0, %v452_v0  ;;  %v48_v5 = vld [vmem:[#allocation2] sm:$0xff]  ;;  %v50_v14 = vld [vmem:[#allocation2 + $0x10] sm:$0xff] }
  0x1f   :  { %345 = vmatpush3.msra.mxu0 %v46_v1  ;;  %v326_v9 = vld [vmem:[%s503_s2] ss:$0 sm:$0xff]  ;;  %s454_s2 = smov [#allocation7]  }
  0x20   :  { %346 = vmatprep.subr.mxu0 %v452_v0  ;;  %s316_s24 = sshll.u32 %s454_s2, 4  ;;  %s317_s24 = int_to_ptr.vmem [resolvable:$true] %s316_s24 }
  0x21   :  { %347 = vmatpush3.msra.mxu0 %v45_v2  ;;  %s422_s25 = scalar_lea.vmem %s317_s24, 128  ;;  %p427_p11 = scmp.lt.s32.totalorder %s317_s24, %s317_s24 }
  0x22   :  { %348 = vmatprep.subr.mxu0 %v452_v0  ;;  %p423_p10 = scmp.ne.s32.totalorder %s317_s24, %s422_s25  ;;  %p428_p12 = scmp.lt.s32.totalorder %s422_s25, %s422_s25 }
  0x23   :  { %349 = vmatpush3.msra.mxu0 %v44_v3 }
  0x24   :  { %350 = vmatprep.subr.mxu0 %v452_v0  ;;  %p429_p13 = por %p428_p12, %p427_p11 }
  0x25   :  { %351 = vmatpush3.msra.mxu0 %v43_v4 }
  0x26   :  { %353 = vmatmul.mubr.msk.f32.vlgmr.msra.gmra.mxu0 %vm57_vm1, %v48_v5  ;;  %p430_p0 = pnand %p429_p13, %p423_p10 }
  0x27   :  { %355 = vmatprep.mubr.msk.f32.mxu0 %vm453_vm0, %v452_v0 }
  0x2a   :  { %356 = vmatmul.mubr.msk.f32.gmra.mxu0 %vm57_vm1, %v49_v6 }
  0x2b   :  { %358 = vmatprep.mubr.msk.f32.mxu0 %vm453_vm0, %v452_v0 }
  0x2e   :  { %359 = vmatmul.mubr.msk.f32.gmra.mxu0 %vm57_vm1, %v50_v14 }
  0xe6   :  { %v133_v7 = vpop.f32.mrf.mxu0 }
  0xe7   :  { %v134_v13 = vadd.f32 %v326_v9, %v133_v7 }
  0xe8   :  { %v354_v8 = vpop.f32.mrf.mxu0 }
  0xea   :  { %v138_v10 = vpop.f32.mrf.mxu0 }
  0xeb   :  { %v139_v11 = vadd.f32 %v326_v9, %v138_v10 }
  0xec   :  { %v357_v12 = vpop.f32.mrf.mxu0 }
  0xed   :  { %362 = vmatpush3.xpose.msk.msra.mxu1 %vm57_vm1, %v139_v11 }
  0xee   :  { %366 = vmatprep.subr.mxu1 %v452_v0  ;;  %v143_v24 = vpop.f32.mrf.mxu0 }
  0xef   :  { %v144_v25 = vadd.f32 %v326_v9, %v143_v24 }
  0xf0   :  { %364 = vmatmul.mubr.msk.f32.vlgmr.msra.gmra.mxu1 %vm57_vm1, %v134_v13  ;;  %v360_v26 = vpop.f32.mrf.mxu0 }
  0xf1   :  { %368 = vmatprep.mubr.msk.f32.mxu1 %vm453_vm0, %v452_v0  ;;  %367 = vmatpush3.msra.mxu1 %v144_v25 }
 0x1b0   :  { %v219_v15 = vpop.f32.mrf.mxu1 }
 0x1b1   :  { %v223_v16 = vmul.f32 10.0, %v219_v15 }
 0x1b2   :  { %v365_v17 = vpop.f32.mrf.mxu1 }
 0x1b3   :  { %v225_v18 = vsel %vm224_vm2, %v223_v16, -inf }
 0x1b4   :  { %226 = vmax.xlane.f32.xlu0 %v225_v18 }
 0x23d   :  { %v227_v19 = vpop.xlane.xlu0 %226 }
 0x23e   :  { %v228_v20 = vsub.f32 %v223_v16, %v227_v19 }
 0x240   :  { %v229_v21 = vmul.f32 1.442695, %v228_v20 }
 0x242   :  { %378 = vpow2.f32 %v229_v21 }
 0x24f   :  { %v379_v22 = vpop.eup %378 }
 0x250   :  { %v231_v23 = vsel %vm224_vm2, %v379_v22, 0.0 }
 0x251   :  { %232 = vadd.xlane.f32.xlu0 %v231_v23 }
 0x2da   :  { %v233_v27 = vpop.xlane.xlu0 %232 }
 0x2db   :  { %380 = vrcp.f32 %v233_v27 }
 0x2e8   :  { %v381_v28 = vpop.eup %380 }
 0x2e9   :  { %v235_v29 = vmul.f32 %v381_v28, %v379_v22 }
 0x2eb   :  { %369 = vmatmul.mubr.msk.f32.vlgmr.msra.gmra.mxu1 %vm224_vm2, %v235_v29 }
 0x3ab   :  { %v305_v30 = vpop.f32.mrf.mxu1 }
 0x3ac   :  { %309 = vst.msk [vmem:[#allocation7] sm:$0xff] %vm57_vm1, %v305_v30 }
 0x3ad   :  { %v370_v31 = vpop.f32.mrf.mxu1 }
 0x3ae   :  { %433 = shalt.err (!%p430_p0)
}
 0x3af   :  { %319 = dma.vmem_to_hbm [thread:$0]  %s317_s24, 128, %s504_s3, [#allocation4]  }
 0x3b0   :  { %446 = dma.done.wait [#allocation4], 128  }
 0x3b1   :  { %447 = vsyncadd [#allocation4], 4294967168 }
 0x3b2   :  { %323 = vsyncpa [#allocation3], 1 }
 0x3b3   :  { %324 = vsyncpa [#allocation6], 1 }
 0x3b4   :  { %325 = vsyncpa [#allocation4], 1 }

</bundles_post_ra>
